<compile_context>
chip_gen: v6e
topology: v6e:2x2x1
jax: 0.10.0
libtpu: 0.0.40
codegen_flags: <defaults>
</compile_context>

<pallas_src>
import functools

import jax
import jax.numpy as jnp
from jax.experimental import pallas as pl
from jax.experimental.pallas import tpu as pltpu


def _round_up(n, m):
    return ((n + m - 1) // m) * m


def _merger_kernel(sm_ref, x_ref, o_ref, *, num_heads, fea_dim, flat, mul_dtype):
    """One batch tile of the weighted head merge.

    sm_ref : (H, F)  f32 precomputed softmax(weight) over heads (resident block)
    x_ref  : (TB, H*F) when `flat` (fea_dim % 128 == 0): lane-aligned head slabs
             (TB, H, F) otherwise: original layout, full (H, F) minor block
    o_ref  : (TB, F) merged output tile
    """
    acc = None
    for h in range(num_heads):            # short static head loop, unrolled
        if flat:
            xh = x_ref[:, h * fea_dim:(h + 1) * fea_dim]      # (TB, F), 128-aligned
        else:
            xh = x_ref[:, h, :]                               # (TB, F)
        wh = sm_ref[h:h + 1, :].astype(mul_dtype)             # (1, F)
        term = (wh * xh.astype(mul_dtype)).astype(jnp.float32)
        acc = term if acc is None else acc + term
    o_ref[...] = acc.astype(o_ref.dtype)


def merger_forward(x, weight, head, *, block_batch=None,
                   vmem_budget_bytes=24 * 1024 * 1024):
    """JAX wrapper matching Merger.forward.

    x      : [bs, head, fea_dim]
    weight : [1, head, fea_dim]  (only used when head > 1)
    """
    if head == 1:
        # Pure glue: squeeze the head dim, no compute to put in a kernel.
        return jnp.squeeze(x, axis=1)

    bs, h, fea_dim = x.shape
    out_dtype = x.dtype
    itemsize = jnp.dtype(x.dtype).itemsize

    # Tiny (H, F) softmax computed once in the wrapper (PyTorch nn.Softmax(dim=1)).
    sm = jax.nn.softmax(jnp.reshape(weight, (h, fea_dim)).astype(jnp.float32), axis=0)

    # Low-precision floats multiply in their native dtype (bf16 VPU on v6e/v7x),
    # accumulation is always f32 inside the kernel.
    if jnp.issubdtype(x.dtype, jnp.floating) and itemsize < 4:
        mul_dtype = x.dtype
    else:
        mul_dtype = jnp.float32

    # Sublane multiple for this dtype: 8 (f32) / 16 (bf16) / 32 (int8/fp8).
    sub = max(8, 32 // itemsize)

    flat = (fea_dim % 128 == 0)

    # Per-batch-row VMEM bytes of the pipelined blocks:
    #   double-buffered x block + double-buffered out block + f32 temp slab.
    f_lane = _round_up(fea_dim, 128)
    if flat:
        x_row = h * fea_dim * itemsize                    # dense (TB, H*F) block
    else:
        x_row = _round_up(h, 8) * f_lane * itemsize       # (H, F) minor-tile padding
    per_row = 2 * x_row + 2 * f_lane * jnp.dtype(out_dtype).itemsize + f_lane * 4

    if block_batch is None:
        tb = vmem_budget_bytes // max(per_row, 1)
        tb = max(sub, min((tb // sub) * sub, 4096))
        # Keep >= ~4 grid steps (pipelining + v7x 2-TC split) when bs allows.
        tb_cap = _round_up(-(-bs // 4), sub)
        tb = max(sub, min(tb, tb_cap))
    else:
        tb = max(sub, (int(block_batch) // sub) * sub)
    # If a single tile covers the batch, use the exact full extent (always legal).
    tb = min(tb, bs)

    grid = (pl.cdiv(bs, tb),)

    if flat:
        x_in = jnp.reshape(x, (bs, h * fea_dim))          # free row-major view, no copy
        x_spec = pl.BlockSpec((tb, h * fea_dim), lambda i: (i, 0))
    else:
        x_in = x
        x_spec = pl.BlockSpec((tb, h, fea_dim), lambda i: (i, 0, 0))

    kernel = functools.partial(_merger_kernel, num_heads=h, fea_dim=fea_dim,
                               flat=flat, mul_dtype=mul_dtype)

    out = pl.pallas_call(
        kernel,
        out_shape=jax.ShapeDtypeStruct((bs, fea_dim), out_dtype),
        grid=grid,
        in_specs=[
            # Tiny softmax weights: same block every step -> resident in VMEM.
            pl.BlockSpec((h, fea_dim), lambda i: (0, 0)),
            x_spec,
        ],
        out_specs=pl.BlockSpec((tb, fea_dim), lambda i: (i, 0)),
        compiler_params=pltpu.CompilerParams(
            # Batch tiles are independent -> let v7x's 2 TensorCores split them.
            dimension_semantics=("parallel",),
            # Explicit scoped-VMEM limit so the 24 MiB block budget is accepted
            # on v5e (16 MiB default) and stays inside v7x's 64 MiB physical.
            vmem_limit_bytes=48 * 1024 * 1024,
        ),
    )(sm, x_in)
    return out


def _reference(x, weight, head):
    """Plain-JAX reference mirroring the PyTorch module."""
    if head == 1:
        return jnp.squeeze(x, axis=1)
    sm = jax.nn.softmax(weight.astype(jnp.float32), axis=1)       # (1, H, F)
    return jnp.sum(sm * x.astype(jnp.float32), axis=1).astype(x.dtype)


if __name__ == "__main__":
    key = jax.random.PRNGKey(0)
    kw, kx, kw2, kx2, kx1, kxb = jax.random.split(key, 6)

    # --- main case: head=4, lane-aligned fea_dim=128, multi-tile batch -------
    head, fea_dim, bs = 4, 128, 48
    # Module init fills the weight with 1.0; perturb so the softmax is non-trivial.
    weight = jnp.ones((1, head, fea_dim), dtype=jnp.float32) \
        + 0.1 * jax.random.normal(kw, (1, head, fea_dim), dtype=jnp.float32)
    x = jax.random.normal(kx, (bs, head, fea_dim), dtype=jnp.float32)

    out = jax.block_until_ready(merger_forward(x, weight, head))
    ref = _reference(x, weight, head)
    assert out.shape == (bs, fea_dim)
    assert jnp.allclose(out, ref, atol=1e-5, rtol=1e-5), "mismatch vs reference (f32)"

    # --- ragged case: fea_dim not a multiple of 128, bs not multiple of tb ---
    head2, fea2, bs2 = 4, 32, 10
    weight2 = jnp.ones((1, head2, fea2), dtype=jnp.float32) \
        + 0.1 * jax.random.normal(kw2, (1, head2, fea2), dtype=jnp.float32)
    x2 = jax.random.normal(kx2, (bs2, head2, fea2), dtype=jnp.float32)
    out2 = jax.block_until_ready(merger_forward(x2, weight2, head2))
    assert out2.shape == (bs2, fea2)
    assert jnp.allclose(out2, _reference(x2, weight2, head2), atol=1e-5, rtol=1e-5), \
        "mismatch vs reference (ragged fea_dim)"

    # --- bf16 path: bf16 multiply / f32 accumulate, sublane multiple 16 ------
    xb = jax.random.normal(kxb, (24, head, fea_dim), dtype=jnp.float32).astype(jnp.bfloat16)
    outb = jax.block_until_ready(merger_forward(xb, weight, head))
    refb = _reference(xb, weight, head)
    assert outb.shape == (24, fea_dim)
    assert jnp.allclose(outb.astype(jnp.float32), refb.astype(jnp.float32),
                        atol=5e-2, rtol=5e-2), "mismatch vs reference (bf16)"

    # --- head == 1 path: pure squeeze (handled in the wrapper) ---------------
    x1 = jax.random.normal(kx1, (8, 1, fea_dim), dtype=jnp.float32)
    out1 = jax.block_until_ready(merger_forward(x1, None, 1))
    assert out1.shape == (8, fea_dim)
    assert jnp.allclose(out1, x1[:, 0, :])

    print("KERNEL_OK")
</pallas_src>

<mosaic_0001>
module attributes {stable_mosaic.version = 11 : i64} {
  func.func @_merger_kernel(%arg0: i32, %arg1: memref<4x128xf32, #tpu.memory_space<vmem>>, %arg2: memref<16x512xf32, #tpu.memory_space<vmem>>, %arg3: memref<16x128xf32, #tpu.memory_space<vmem>>) attributes {dimension_semantics = [#tpu.dimension_semantics<parallel>], iteration_bounds = array<i64: 3>, scalar_prefetch = 0 : i64, scratch_operands = 0 : i64, tpu.core_type = #tpu.core_type<tc>, window_params = [{pipeline_mode = #tpu.pipeline_mode<synchronous>, transform_indices = @transform_0, window_bounds = array<i64: 4, 128>}, {transform_indices = @transform_1, window_bounds = array<i64: 16, 512>}, {transform_indices = @transform_2, window_bounds = array<i64: 16, 128>}]} {
    %c0 = arith.constant 0 : index
    %c0_0 = arith.constant 0 : index
    %0 = vector.load %arg2[%c0, %c0_0] : memref<16x512xf32, #tpu.memory_space<vmem>>, vector<16x128xf32>
    %c0_1 = arith.constant 0 : index
    %c0_2 = arith.constant 0 : index
    %1 = vector.load %arg1[%c0_1, %c0_2] : memref<4x128xf32, #tpu.memory_space<vmem>>, vector<1x128xf32>
    %2 = vector.broadcast %1 : vector<1x128xf32> to vector<16x128xf32>
    %3 = arith.mulf %2, %0 : vector<16x128xf32>
    %c0_3 = arith.constant 0 : index
    %c128 = arith.constant 128 : index
    %4 = vector.load %arg2[%c0_3, %c128] : memref<16x512xf32, #tpu.memory_space<vmem>>, vector<16x128xf32>
    %c1 = arith.constant 1 : index
    %c0_4 = arith.constant 0 : index
    %5 = vector.load %arg1[%c1, %c0_4] : memref<4x128xf32, #tpu.memory_space<vmem>>, vector<1x128xf32>
    %6 = vector.broadcast %5 : vector<1x128xf32> to vector<16x128xf32>
    %7 = arith.mulf %6, %4 : vector<16x128xf32>
    %8 = arith.addf %3, %7 : vector<16x128xf32>
    %c0_5 = arith.constant 0 : index
    %c256 = arith.constant 256 : index
    %9 = vector.load %arg2[%c0_5, %c256] : memref<16x512xf32, #tpu.memory_space<vmem>>, vector<16x128xf32>
    %c2 = arith.constant 2 : index
    %c0_6 = arith.constant 0 : index
    %10 = vector.load %arg1[%c2, %c0_6] : memref<4x128xf32, #tpu.memory_space<vmem>>, vector<1x128xf32>
    %11 = vector.broadcast %10 : vector<1x128xf32> to vector<16x128xf32>
    %12 = arith.mulf %11, %9 : vector<16x128xf32>
    %13 = arith.addf %8, %12 : vector<16x128xf32>
    %c0_7 = arith.constant 0 : index
    %c384 = arith.constant 384 : index
    %14 = vector.load %arg2[%c0_7, %c384] : memref<16x512xf32, #tpu.memory_space<vmem>>, vector<16x128xf32>
    %c3 = arith.constant 3 : index
    %c0_8 = arith.constant 0 : index
    %15 = vector.load %arg1[%c3, %c0_8] : memref<4x128xf32, #tpu.memory_space<vmem>>, vector<1x128xf32>
    %16 = vector.broadcast %15 : vector<1x128xf32> to vector<16x128xf32>
    %17 = arith.mulf %16, %14 : vector<16x128xf32>
    %18 = arith.addf %13, %17 : vector<16x128xf32>
    %c0_9 = arith.constant 0 : index
    %c0_10 = arith.constant 0 : index
    %19 = vector.load %arg3[%c0_9, %c0_10] : memref<16x128xf32, #tpu.memory_space<vmem>>, vector<16x128xf32>
    tpu.vector_store %arg3[%c0_9, %c0_10], %18 {strides = array<i32>} : memref<16x128xf32, #tpu.memory_space<vmem>>, vector<16x128xf32>,
    return
  }
  func.func @transform_0(%arg0: i32) -> (i32, i32) {
    %c0_i32 = arith.constant 0 : i32
    %c0_i32_0 = arith.constant 0 : i32
    %c0_i32_1 = arith.constant 0 : i32
    return %c0_i32, %c0_i32_0 : i32, i32
  }
  func.func @transform_1(%arg0: i32) -> (i32, i32) {
    %c0_i32 = arith.constant 0 : i32
    %c0_i32_0 = arith.constant 0 : i32
    return %arg0, %c0_i32 : i32, i32
  }
  func.func @transform_2(%arg0: i32) -> (i32, i32) {
    %c0_i32 = arith.constant 0 : i32
    %c0_i32_0 = arith.constant 0 : i32
    return %arg0, %c0_i32 : i32, i32
  }
}

</mosaic_0001>

<bundles_post_ra>
// kernel: tpu_custom_call.1
= control target key start
LH: loop header
LB: loop body
LE: loop exit
PB: predicated region body
PF: predicated region fallthrough
CT: control target
= control target key end

     0   :  { %7 = vsyncpa [#allocation3], 0  ;;  %s732_s0 = inlined_call_operand.hbm [shape: f32[4,128], index: 0, kind: input, shape index: {}]   ;;  %s733_s1 = inlined_call_operand.hbm [shape: f32[48,512], index: 1, kind: input, shape index: {}]   ;;  %s734_s2 = inlined_call_operand.hbm [shape: f32[48,128], index: 2, kind: output, shape index: {}]  }
   0x1   :  { %8 = vsyncpa [#allocation6], 0 }
   0x2   :  { %10 = vsyncpa [#allocation6 + $0x1], 0 }
   0x3   :  { %11 = vsyncpa [#allocation4], 0 }
   0x4   :  { %13 = vsyncpa [#allocation4 + $0x1], 0  ;;  %s552_s9 = smov 0   ;;  %s554_s10 = smov 0  }
   0x5   :  { %s556_s11 = smov 0   ;;  %s558_s12 = smov 0  }
   0x6 LB: > { %s573_s13 = sadd.s32 4294967295, %s528_s12   ;;  %s321_s14 = sadd.s32 4294967294, %s528_s12   ;;  %s528_s12 = sphi %s558_s12, %s755_s12   ;;  %s524_s11 = sphi %s556_s11, %s754_s11   ;;  %s520_s10 = sphi %s554_s10, %s753_s10   ;;  %s516_s9 = sphi %s552_s9, %s752_s9  }
   0x7   : > { %s577_s15 = sadd.s32 1, %s528_s12   ;;  %s47_s16 = sadd.s32 1, %s524_s11 }
   0x8   : > { %s44_s17 = ssub.s32 %s528_s12, %s577_s15  ;;  %p54_p0 = scmp.ne.s32.totalorder %s524_s11, %s520_s10 }
   0x9   : > { %p45_p1 = scmp.eq.s32.totalorder %s44_s17, 0  ;;  %p55_p2 = scmp.eq.s32.totalorder %s528_s12, 0 }
   0xa   : > { %p60_p3 = scmp.ne.s32.totalorder %s520_s10, %s516_s9  ;;  %p736_p4 = scmp.eq.s32.totalorder %s573_s13, 0 }
   0xb   : > { %s589_s18 = scalar_select %p45_p1, %s524_s11, %s47_s16  }
   0xc   : > { %p591_p5 = por %p55_p2, %p54_p0  ;;  %p597_p6 = por %p736_p4, %p60_p3 }
   0xd   : > { %p84_p7 = scmp.eq.s32.totalorder %s573_s13, 2  ;;  %p90_p8 = scmp.eq.s32.totalorder %s321_s14, 2 }
   0xe   : > { %s740_s20 = scalar_select %p597_p6, 1, 0 }
   0xf   : > { %p322_p9 = scmp.ge.s32.totalorder %s528_s12, 1  ;;  %p97_p10 = scmp.lt.s32.totalorder %s528_s12, 4 }
  0x10   : > { %p604_p11 = por %p84_p7, %p54_p0  ;;  %p608_p12 = por %p90_p8, %p60_p3 }
  0x11   : > { %p612_p13 = pnand %p322_p9, %p97_p10  ;;  %s530_s24 = smov [#allocation2]  }
  0x12   : > { %s741_s21 = scalar_select %p604_p11, 1, 0 }
  0x13   : > { %s742_s22 = scalar_select %p608_p12, 1, 0 }
  0x14   : > { %s743_s23 = scalar_select %p612_p13, 1, 0 }
  0x15   : > { %p353_p1 = pneg %p612_p13  ;;  %s110_s25 = sshll.u32 %s530_s24, 4  ;;  %s111_s25 = int_to_ptr.vmem [resolvable:$true] %s110_s25 }
  0x16   : > { %p366_p2 = scmp.lt.s32.totalorder %s528_s12, 3  ;;  %s121_s27 = sand.u32 1, %s524_s11  }
  0x17   : > { %p621_p0 = pnand %p353_p1, %p736_p4  ;;  %s325_s29 = sshll.u32 %s121_s27, 6 }
  0x18   : > { %p628_p3 = pnand %p366_p2, %p591_p5  ;;  %s417_s30 = scalar_lea.vmem %s111_s25, 64 }
  0x19   : > { %p408_p7 = pneg %p621_p0  ;;  %p418_p8 = scmp.ne.s32.totalorder %s111_s25, %s417_s30 }
  0x1a   : > { %p425_p12 = scmp.lt.s32.totalorder %s111_s25, %s111_s25  ;;  %p426_p11 = scmp.lt.s32.totalorder %s417_s30, %s417_s30 }
  0x1b   : > { %p420_p9 = pnand %p418_p8, %p408_p7 }
  0x1c   : > { %p427_p1 = por %p426_p11, %p425_p12 }
  0x1d   : > { %p421_p10 = pneg %p420_p9 }
  0x1f   : > { %p428_p4 = pnand %p427_p1, %p421_p10 }
  0x21   : > { %431 = shalt.err (!%p428_p4)
}
  0x22   : > { %356 = dma.hbm_to_vmem [thread:$0]  (!%p621_p0), %s732_s0, 64, %s111_s25, [#allocation3]  }
  0x23   : > { %s343_s5 = sshll.u32 %s528_s12, 10  ;;  %s125_s6 = scalar_lea.vmem [#allocation5], %s325_s29 }
  0x24   : > { %s133_s7 = sshll.u32 %s125_s6, 4  ;;  %s643_s16 = scalar_lea.hbm %s733_s1, %s343_s5  ;;  %s645_s7 = int_to_ptr.vmem [resolvable:$true] %s133_s7 }
  0x25   : > { %s647_s17 = scalar_lea.sflag [#allocation6], %s121_s27  ;;  %s432_s19 = scalar_lea.hbm %s643_s16, 1024 }
  0x26   : > { %p433_p4 = scmp.ne.s32.totalorder %s643_s16, %s432_s19  ;;  %p434_p5 = pneg %p628_p3 }
  0x27   : > { %s437_s26 = scalar_lea.hbm %s733_s1, 3072  ;;  %p438_p2 = scmp.lt.s32.totalorder %s643_s16, %s733_s1 }
  0x28   : > { %p435_p11 = pnand %p434_p5, %p433_p4  ;;  %p439_p0 = scmp.lt.s32.totalorder %s437_s26, %s432_s19 }
  0x2a   : > { %p436_p12 = pneg %p435_p11  ;;  %p440_p7 = por %p439_p0, %p438_p2 }
  0x2c   : > { %p441_p8 = pnand %p440_p7, %p436_p12 }
  0x2e   : > { %444 = shalt.err (!%p441_p8)
}
  0x2f   : > { %s445_s27 = scalar_lea.vmem %s645_s7, 1024  ;;  %s531_s3 = smov [#allocation5]  }
  0x30   : > { %p446_p9 = scmp.ne.s32.totalorder %s645_s7, %s445_s27  ;;  %s450_s4 = sshll.u32 %s531_s3, 4  ;;  %s451_s4 = int_to_ptr.vmem [resolvable:$false] %s450_s4 }
  0x31   : > { %s452_s5 = scalar_lea.vmem %s451_s4, 2048  ;;  %p453_p4 = scmp.lt.s32.totalorder %s645_s7, %s451_s4 }
  0x32   : > { %p448_p10 = pnand %p446_p9, %p434_p5  ;;  %p454_p11 = scmp.lt.s32.totalorder %s452_s5, %s445_s27 }
  0x34   : > { %p449_p1 = pneg %p448_p10  ;;  %p455_p6 = por %p454_p11, %p453_p4 }
  0x36   : > { %p456_p13 = pnand %p455_p6, %p449_p1 }
  0x38   : > { %459 = shalt.err (!%p456_p13)
}
  0x39   : > { %s532_s6 = smov 512   ;;  %s533_s8 = smov 32  }
  0x3a   : > { %360 = dma.hbm_to_vmem [thread:$0]  (!%p628_p3), %s643_s16, 1024, %s645_s7, %s647_s17, %s532_s6, %s532_s6, %s533_s8  }
  0x3b   : > { %p746_p5 = scmp.ne.s32.totalorder %s743_s23, 0 }
  0x3c   : > { %p747_p12 = scmp.eq.s32.totalorder (!%p746_p5), %s573_s13, 0 }
  0x3d   : > { %145 = sbr.rel (%p746_p5) target bundleno = 98 (0x62), region = 28 }
  0x42   : > { %503 = dma.done.wait (%p747_p12), [#allocation3], 64   ;;  %p748_p2 = pmov %p747_p12 }
  0x43   : > { %s675_s14 = sand.u32 1, %s520_s10   ;;  %p749_p6 = scmp.ne.s32.totalorder %s740_s20, 0 }
  0x44   : > { %505 = vsyncadd (%p748_p2), [#allocation3], 4294967232  ;;  %s331_s19 = sshll.u32 %s675_s14, 6  ;;  %s152_s24 = scalar_lea.sflag [#allocation6], %s675_s14 }
  0x45   : > { %s155_s25 = scalar_lea.vmem [#allocation5], %s331_s19 }
  0x46   : > { %507 = dma.done.wait (%p749_p6), %s152_s24, 1024  }
  0x47   : > { %509 = vsyncadd (%p749_p6), %s152_s24, 4294966272  ;;  %s332_s23 = sshll.u32 %s675_s14, 4  ;;  %v178_v0 = vld [vmem:[%s155_s25] sm:$0xff]  ;;  %v333_v1 = vld [vmem:[#allocation2] ss:$0 sm:$0xff]  ;;  %s344_s7 = sshll.u32 %s573_s13, 8 }
  0x48   : > { %v187_v2 = vld [vmem:[%s155_s25 + $0x8] sm:$0xff]  ;;  %v185_v3 = vmul.f32 %v333_v1, %v178_v0  ;;  %v334_v4 = vld [vmem:[#allocation2 + $0x1] ss:$0 sm:$0xff]  ;;  %v198_v5 = vld [vmem:[%s155_s25 + $0x10] sm:$0xff]  ;;  %s175_s20 = scalar_lea.vmem [#allocation7], %s332_s23  ;;  %s690_s26 = scalar_lea.hbm %s734_s2, %s344_s7 }
  0x49   : > { %v335_v6 = vld [vmem:[#allocation2 + $0x2] ss:$0 sm:$0xff]  ;;  %v194_v7 = vmul.f32 %v334_v4, %v187_v2  ;;  %v336_v10 = vld [vmem:[#allocation2 + $0x3] ss:$0 sm:$0xff]  ;;  %v179_v11 = vld [vmem:[%s155_s25 + $0x20] sm:$0xff]  ;;  %s236_s28 = sshll.u32 %s175_s20, 4  ;;  %s685_s28 = int_to_ptr.vmem [resolvable:$true] %s236_s28 }
  0x4a   : > { %v205_v8 = vmul.f32 %v335_v6, %v198_v5  ;;  %v209_v9 = vld [vmem:[%s155_s25 + $0x18] sm:$0xff]  ;;  %v186_v12 = vmul.f32 %v333_v1, %v179_v11  ;;  %v188_v13 = vld [vmem:[%s155_s25 + $0x28] sm:$0xff]  ;;  %v199_v14 = vld [vmem:[%s155_s25 + $0x30] sm:$0xff]  ;;  %s223_s29 = scalar_lea.sflag [#allocation4], %s675_s14  ;;  %s460_s30 = scalar_lea.vmem %s685_s28, 256 }
  0x4b   : > { %v210_v15 = vld [vmem:[%s155_s25 + $0x38] sm:$0xff]  ;;  %v196_v16 = vadd.f32 %v194_v7, %v185_v3  ;;  %v216_v17 = vmul.f32 %v336_v10, %v209_v9  ;;  %v195_v18 = vmul.f32 %v334_v4, %v188_v13  ;;  %v206_v19 = vmul.f32 %v335_v6, %v199_v14  ;;  %p461_p13 = scmp.ne.s32.totalorder %s685_s28, %s460_s30  ;;  %p750_p3 = scmp.ne.s32.totalorder %s741_s21, 0 }
  0x4c   : > { %v217_v22 = vmul.f32 %v336_v10, %v210_v15  ;;  %s534_s13 = smov [#allocation7]  }
  0x4d   : > { %v207_v20 = vadd.f32 %v205_v8, %v196_v16  ;;  %v197_v21 = vadd.f32 %v195_v18, %v186_v12  ;;  %p462_p0 = pnand %p461_p13, %p750_p3  ;;  %s464_s27 = sshll.u32 %s534_s13, 4  ;;  %s465_s27 = int_to_ptr.vmem [resolvable:$false] %s464_s27 }
  0x4e   : > { %s466_s3 = scalar_lea.vmem %s465_s27, 512  ;;  %p467_p8 = scmp.lt.s32.totalorder %s685_s28, %s465_s27 }
  0x4f   : > { %v218_v23 = vadd.f32 %v216_v17, %v207_v20  ;;  %v208_v24 = vadd.f32 %v206_v19, %v197_v21  ;;  %p463_p7 = pneg %p462_p0  ;;  %p468_p9 = scmp.lt.s32.totalorder %s466_s3, %s460_s30 }
  0x51   : > { %220 = vst [vmem:[%s175_s20] sm:$0xff] %v218_v23  ;;  %v219_v25 = vadd.f32 %v217_v22, %v208_v24  ;;  %p469_p10 = por %p468_p9, %p467_p8 }
  0x53   : > { %221 = vst [vmem:[%s175_s20 + $0x8] sm:$0xff] %v219_v25  ;;  %p470_p1 = pnand %p469_p10, %p463_p7 }
  0x55   : > { %473 = shalt.err (!%p470_p1)
}
  0x56   : > { %s474_s4 = scalar_lea.hbm %s690_s26, 256  ;;  %s478_s8 = scalar_lea.hbm %s734_s2, 768 }
  0x57   : > { %p475_p4 = scmp.ne.s32.totalorder %s690_s26, %s474_s4  ;;  %p479_p12 = scmp.lt.s32.totalorder %s690_s26, %s734_s2 }
  0x58   : > { %p480_p2 = scmp.lt.s32.totalorder %s478_s8, %s474_s4 }
  0x59   : > { %p476_p11 = pnand %p475_p4, %p750_p3 }
  0x5a   : > { %p481_p6 = por %p480_p2, %p479_p12 }
  0x5b   : > { %p477_p5 = pneg %p476_p11 }
  0x5d   : > { %p482_p13 = pnand %p481_p6, %p477_p5 }
  0x5f   : > { %485 = shalt.err (!%p482_p13)
}
  0x60   : > { %s535_s25 = smov 128   ;;  %s536_s23 = smov 8  }
  0x61   : > { %351 = dma.vmem_to_hbm [thread:$0]  (%p750_p3), %s685_s28, 256, %s690_s26, %s223_s29, %s535_s25, %s535_s25, %s536_s23  }
  0x62 PF: > { %p368_p0 = scmp.ge.s32.totalorder %s528_s12, 2  ;;  %s251_s20 = sand.u32 1, %s516_s9  }
  0x63   : > { %p751_p7 = scmp.ne.s32.totalorder %s742_s22, 0  ;;  %s252_s7 = scalar_lea.sflag [#allocation4], %s251_s20 }
  0x65   : > { %p362_p8 = pnand %p368_p0, %p751_p7 }
  0x67   : > { %p363_p9 = pneg %p362_p8 }
  0x69   : > { %511 = dma.done.wait (%p363_p9), %s252_s7, 256  }
  0x6a   : > { %513 = vsyncadd (%p363_p9), %s252_s7, 4294967040  ;;  %p16_p10 = scmp.ge.s32.totalorder %s577_s15, 5   ;;  %s752_s9 = smov %s520_s10 }
  0x6b   : > { %s753_s10 = smov %s524_s11  ;;  %s754_s11 = smov %s589_s18 }
  0x6c   : > { %s755_s12 = smov %s577_s15  ;;  %18 = sbr.rel (!%p16_p10) target bundleno = 6 (0x6), region = 78 }
  0x71   :  { %257 = vsyncpa [#allocation3], 1 }
  0x72   :  { %259 = vsyncpa [#allocation3 + $0x1], 1 }
  0x73   :  { %260 = vsyncpa [#allocation6], 1 }
  0x74   :  { %262 = vsyncpa [#allocation6 + $0x1], 1 }
  0x75   :  { %263 = vsyncpa [#allocation4], 1 }
  0x76   :  { %265 = vsyncpa [#allocation4 + $0x1], 1 }

</bundles_post_ra>
